<compile_context>
chip_gen: v5e
topology: v5e:2x2
jax: 0.10.0
libtpu: 0.0.40
codegen_flags: <defaults>
</compile_context>

<pallas_src>
import functools

import jax
import jax.numpy as jnp
from jax.experimental import pallas as pl
from jax.experimental.pallas import tpu as pltpu


def _cdiv(a, b):
    return -(-a // b)


def _round_up(x, m):
    return ((x + m - 1) // m) * m


_VMEM_CAP_CACHE = [None]


def _vmem_capacity_bytes():
    """Physical VMEM bytes for this generation (cached; conservative fallback)."""
    if _VMEM_CAP_CACHE[0] is None:
        cap = 64 * 1024 * 1024  # conservative fallback: v7x per-TC physical VMEM
        try:
            info = pltpu.get_tpu_info()
            cap_attr = getattr(info, "vmem_capacity_bytes", None)
            if cap_attr:
                cap = int(cap_attr)
        except Exception:
            pass
        _VMEM_CAP_CACHE[0] = cap
    return _VMEM_CAP_CACHE[0]


def _soft_ce_kernel(x_ref, t_ref, o_ref, *, n_rows, tile_rows):
    # x_ref, t_ref: (tile_rows, C) blocks; o_ref: (tile_rows, 1) per-sample loss.
    # Math in f32 regardless of input dtype (max/exp/log need it; the
    # multiply-accumulate stays f32 too: precision > the marginal bf16 saving).
    xf = x_ref[...].astype(jnp.float32)

    # Numerically-stable log-sum-exp along the class (lane) axis.
    m = jnp.max(xf, axis=1, keepdims=True)                            # (tile, 1)
    lse = jnp.log(jnp.sum(jnp.exp(xf - m), axis=1, keepdims=True))    # (tile, 1)

    # Fused soft cross-entropy: sum_c t * ((m + lse) - x)
    #   == sum_c t * -log_softmax(x)   (exact, unnormalized-target safe).
    t = t_ref[...].astype(jnp.float32)
    loss = jnp.sum(t * ((m + lse) - xf), axis=1, keepdims=True)       # (tile, 1)

    if n_rows % tile_rows != 0:
        # Ragged last block: rows >= n_rows came from the undefined padded
        # region of the block read -> force their (discarded) loss to 0 so
        # no inf/NaN is ever stored.
        row = (pl.program_id(0) * tile_rows
               + jax.lax.broadcasted_iota(jnp.int32, (tile_rows, 1), 0))
        loss = jnp.where(row < n_rows, loss, 0.0)

    o_ref[...] = loss


@functools.partial(jax.jit, static_argnames=("reduce", "tile_n"))
def soft_cross_entropy(inputs, target, reduce=True, tile_n=None):
    """inputs: [N, C] logits, target: [N, C] soft labels (any float dtype)."""
    n, c = inputs.shape
    assert target.shape == (n, c)

    x_item = jnp.dtype(inputs.dtype).itemsize
    t_item = jnp.dtype(target.dtype).itemsize

    vmem_cap = _vmem_capacity_bytes()
    # ~5/8 of physical VMEM for the pipelined working set:
    # ~40 MiB on v7x (64 MiB/TC), ~80 MiB on v5e/v6e (128 MiB).
    input_budget = (vmem_cap * 5) // 8
    if tile_n is None:
        tile_n = 2048 if vmem_cap >= (100 << 20) else 1024

    # Bytes per tile row: 2x double-buffered input blocks + f32-widened
    # intermediates + lane-padded (x128) double-buffered output column.
    per_row = 2 * c * (x_item + t_item) + 2 * c * 4 + 2 * 128 * 4
    max_tile_vmem = max(((input_budget // per_row) // 8) * 8, 8)

    # --- pick the row tile ---------------------------------------------------
    eff_tile = min(tile_n, max_tile_vmem, _round_up(n, 8))
    eff_tile = max((eff_tile // 8) * 8, 8)            # sublane-aligned row tile
    if n > 8:
        # Guarantee >= 2 grid steps so v7x's two TensorCores both get work.
        eff_tile = min(eff_tile, _round_up(_cdiv(n, 2), 8))
    num_tiles = _cdiv(n, eff_tile)
    if num_tiles > 1:
        # Prefer an even tile count for 2-TC load balance while tiles stay
        # large, then rebalance so blocks are near-equal (small ragged tail).
        if num_tiles % 2 == 1 and _round_up(_cdiv(n, num_tiles + 1), 8) >= 256:
            num_tiles += 1
        eff_tile = _round_up(_cdiv(n, num_tiles), 8)
    num_tiles = _cdiv(n, eff_tile)

    # VMEM limit: pipelined inputs + f32 intermediates + output blocks + headroom.
    vmem_bytes = (2 * eff_tile * c * (x_item + t_item)
                  + 2 * eff_tile * c * 4
                  + 2 * eff_tile * 128 * 4
                  + (4 << 20))
    vmem_bytes = int(min(max(vmem_bytes, 16 << 20), (vmem_cap * 3) // 4))

    kernel = functools.partial(_soft_ce_kernel, n_rows=n, tile_rows=eff_tile)

    per_sample = pl.pallas_call(
        kernel,
        out_shape=jax.ShapeDtypeStruct((n, 1), jnp.float32),
        grid_spec=pltpu.PrefetchScalarGridSpec(
            num_scalar_prefetch=0,
            grid=(num_tiles,),
            in_specs=[
                pl.BlockSpec((eff_tile, c), lambda i: (i, 0)),
                pl.BlockSpec((eff_tile, c), lambda i: (i, 0)),
            ],
            out_specs=pl.BlockSpec((eff_tile, 1), lambda i: (i, 0)),
        ),
        compiler_params=pltpu.CompilerParams(
            dimension_semantics=("parallel",),   # v7x: shard row tiles across 2 TCs
            vmem_limit_bytes=vmem_bytes,
        ),
    )(inputs, target)[:, 0]

    if reduce:
        # torch.sum(log_likelihood * target) / sample_num
        return jnp.sum(per_sample) / n
    # torch.sum(..., dim=1) -> vector of shape [N]
    return per_sample


def _reference(inputs, target, reduce=True):
    x = inputs.astype(jnp.float32)
    log_softmax = x - jax.scipy.special.logsumexp(x, axis=1, keepdims=True)
    per_sample = jnp.sum(-log_softmax * target.astype(jnp.float32), axis=1)
    if reduce:
        return jnp.sum(per_sample) / inputs.shape[0]
    return per_sample


if __name__ == "__main__":
    key = jax.random.PRNGKey(0)
    k1, k2, k3, k4 = jax.random.split(key, 4)

    # --- small shape matching the original module (sample_num=8, class_num=32)
    N, C = 8, 32
    inputs = jax.random.normal(k1, (N, C), dtype=jnp.float32)
    target = jax.nn.softmax(jax.random.normal(k2, (N, C), dtype=jnp.float32), axis=1)

    loss = jax.block_until_ready(soft_cross_entropy(inputs, target, reduce=True))
    ref = _reference(inputs, target, reduce=True)
    assert jnp.allclose(loss, ref, atol=1e-5, rtol=1e-5), (loss, ref)

    loss_vec = jax.block_until_ready(soft_cross_entropy(inputs, target, reduce=False))
    ref_vec = _reference(inputs, target, reduce=False)
    assert loss_vec.shape == (N,)
    assert jnp.allclose(loss_vec, ref_vec, atol=1e-5, rtol=1e-5)

    # --- ragged multi-tile grid: no padding copies, in-kernel row mask -------
    N2, C2 = 300, 256
    x2 = jax.random.normal(k3, (N2, C2), dtype=jnp.float32)
    t2 = jax.nn.softmax(jax.random.normal(k4, (N2, C2), dtype=jnp.float32), axis=1)

    l2 = jax.block_until_ready(soft_cross_entropy(x2, t2, reduce=True))
    r2 = _reference(x2, t2, reduce=True)
    assert jnp.allclose(l2, r2, atol=1e-4, rtol=1e-5), (l2, r2)

    l2v = jax.block_until_ready(soft_cross_entropy(x2, t2, reduce=False))
    r2v = _reference(x2, t2, reduce=False)
    assert l2v.shape == (N2,)
    assert jnp.allclose(l2v, r2v, atol=1e-4, rtol=1e-4)

    # --- bf16 inputs (halves HBM read traffic; kernel does f32 math) --------
    x2b, t2b = x2.astype(jnp.bfloat16), t2.astype(jnp.bfloat16)
    l2b = jax.block_until_ready(soft_cross_entropy(x2b, t2b, reduce=False))
    r2b = _reference(x2b, t2b, reduce=False)
    assert l2b.shape == (N2,)
    assert jnp.allclose(l2b, r2b, atol=1e-3, rtol=1e-3)

    print("KERNEL_OK")
</pallas_src>

<mosaic_0001>
module attributes {stable_mosaic.version = 11 : i64} {
  func.func @_soft_ce_kernel(%arg0: i32, %arg1: memref<8x32xf32, #tpu.memory_space<vmem>>, %arg2: memref<8x32xf32, #tpu.memory_space<vmem>>, %arg3: memref<8x1xf32, #tpu.memory_space<vmem>>) attributes {dimension_semantics = [#tpu.dimension_semantics<parallel>], iteration_bounds = array<i64: 1>, scalar_prefetch = 0 : i64, scratch_operands = 0 : i64, tpu.core_type = #tpu.core_type<tc>, window_params = [{transform_indices = @transform_0, window_bounds = array<i64: 8, 32>}, {transform_indices = @transform_1, window_bounds = array<i64: 8, 32>}, {transform_indices = @transform_2, window_bounds = array<i64: 8, 1>}]} {
    %c0 = arith.constant 0 : index
    %c0_0 = arith.constant 0 : index
    %0 = vector.load %arg1[%c0, %c0_0] : memref<8x32xf32, #tpu.memory_space<vmem>>, vector<8x32xf32>
    %cst = arith.constant dense<0xFF800000> : vector<8xf32>
    %1 = vector.multi_reduction <maximumf>, %0, %cst [1] : vector<8x32xf32> to vector<8xf32>
    %2 = vector.shape_cast %1 : vector<8xf32> to vector<8x1xf32>
    %3 = vector.broadcast %2 : vector<8x1xf32> to vector<8x32xf32>
    %4 = arith.subf %0, %3 : vector<8x32xf32>
    %5 = math.exp %4 : vector<8x32xf32>
    %cst_1 = arith.constant dense<0.000000e+00> : vector<8xf32>
    %6 = vector.multi_reduction <add>, %5, %cst_1 [1] : vector<8x32xf32> to vector<8xf32>
    %7 = vector.shape_cast %6 : vector<8xf32> to vector<8x1xf32>
    %8 = math.log %7 : vector<8x1xf32>
    %c0_2 = arith.constant 0 : index
    %c0_3 = arith.constant 0 : index
    %9 = vector.load %arg2[%c0_2, %c0_3] : memref<8x32xf32, #tpu.memory_space<vmem>>, vector<8x32xf32>
    %10 = arith.addf %2, %8 : vector<8x1xf32>
    %11 = vector.broadcast %10 : vector<8x1xf32> to vector<8x32xf32>
    %12 = arith.subf %11, %0 : vector<8x32xf32>
    %13 = arith.mulf %9, %12 : vector<8x32xf32>
    %cst_4 = arith.constant dense<0.000000e+00> : vector<8xf32>
    %14 = vector.multi_reduction <add>, %13, %cst_4 [1] : vector<8x32xf32> to vector<8xf32>
    %15 = vector.shape_cast %14 : vector<8xf32> to vector<8x1xf32>
    %c0_5 = arith.constant 0 : index
    %c0_6 = arith.constant 0 : index
    %16 = vector.load %arg3[%c0_5, %c0_6] : memref<8x1xf32, #tpu.memory_space<vmem>>, vector<8x1xf32>
    tpu.vector_store %arg3[%c0_5, %c0_6], %15 {strides = array<i32>} : memref<8x1xf32, #tpu.memory_space<vmem>>, vector<8x1xf32>,
    return
  }
  func.func @transform_0(%arg0: i32) -> (i32, i32) {
    %c0_i32 = arith.constant 0 : i32
    %c0_i32_0 = arith.constant 0 : i32
    return %arg0, %c0_i32 : i32, i32
  }
  func.func @transform_1(%arg0: i32) -> (i32, i32) {
    %c0_i32 = arith.constant 0 : i32
    %c0_i32_0 = arith.constant 0 : i32
    return %arg0, %c0_i32 : i32, i32
  }
  func.func @transform_2(%arg0: i32) -> (i32, i32) {
    %c0_i32 = arith.constant 0 : i32
    %c0_i32_0 = arith.constant 0 : i32
    return %arg0, %c0_i32 : i32, i32
  }
}

</mosaic_0001>

<bundles_post_ra>
// kernel: soft_cross_entropy.1
= control target key start
LH: loop header
LB: loop body
LE: loop exit
PB: predicated region body
PF: predicated region fallthrough
CT: control target
= control target key end

     0   :  { %7 = vsyncpa [#allocation3], 0  ;;  %s154_s0 = inlined_call_operand.hbm [shape: f32[8,32], index: 0, kind: input, shape index: {}]   ;;  %s155_s1 = inlined_call_operand.hbm [shape: f32[8,32], index: 1, kind: input, shape index: {}]   ;;  %s156_s2 = inlined_call_operand.vmem [shape: f32[8,1], index: 2, kind: output, shape index: {}]  }
   0x1   :  { %s14_s11 = sshll.u32 %s154_s0, 4  ;;  %s15_s11 = int_to_ptr.hbm [resolvable:$true] %s14_s11 }
   0x2   :  { %8 = vsyncpa [#allocation5], 0  ;;  %s125_s12 = smov [#allocation2]   ;;  %s25_s16 = sshll.u32 %s155_s1, 4  ;;  %s26_s16 = int_to_ptr.hbm [resolvable:$true] %s25_s16 }
   0x3   :  { %s16_s13 = sshll.u32 %s125_s12, 4  ;;  %s126_s17 = smov [#allocation4]   ;;  %s17_s13 = int_to_ptr.vmem [resolvable:$true] %s16_s13 }
   0x4   :  { %19 = dma.hbm_to_vmem [thread:$0]  %s15_s11, 128, %s17_s13, [#allocation3]  }
   0x5   :  { %s27_s18 = sshll.u32 %s126_s17, 4  ;;  %s28_s18 = int_to_ptr.vmem [resolvable:$true] %s27_s18 }
   0x6   :  { %30 = dma.hbm_to_vmem [thread:$0]  %s26_s16, 128, %s28_s18, [#allocation5]  }
   0x7   :  { %121 = dma.done.wait [#allocation3], 128  }
   0x8   :  { %122 = vsyncadd [#allocation3], 4294967168 }
   0x9   :  { %123 = dma.done.wait [#allocation5], 128  }
   0xa   :  { %124 = vsyncadd [#allocation5], 4294967168  ;;  %vm40_vm0 = vcmask 261120   ;;  %v39_v0 = vld [vmem:[#allocation2] sm:$0xff]  ;;  %v52_v11 = vld [vmem:[#allocation4] sm:$0xff]  ;;  %vm59_vm1 = vcmask 7168  }
   0xb   :  { %v41_v1 = vsel %vm40_vm0, %v39_v0, -inf }
   0xc   :  { %42 = vmax.xlane.f32.xlu0 %v41_v1 }
  0x7f   :  { %v43_v2 = vpop.xlane.xlu0 %42 }
  0x80   :  { %v44_v3 = vsub.f32 %v39_v0, %v43_v2 }
  0x82   :  { %v45_v4 = vmul.f32 1.442695, %v44_v3 }
  0x84   :  { %69 = vpow2.f32 %v45_v4 }
  0x8a   :  { %v70_v5 = vpop.eup %69 }
  0x8b   :  { %v47_v6 = vsel %vm40_vm0, %v70_v5, 0.0 }
  0x8c   :  { %48 = vadd.xlane.f32.xlu0 %v47_v6 }
  0xff   :  { %v49_v7 = vpop.xlane.xlu0 %48 }
 0x100   :  { %71 = vlog2.f32 %v49_v7 }
 0x106   :  { %v72_v8 = vpop.eup %71 }
 0x107   :  { %v51_v9 = vmul.f32 0.6931472, %v72_v8 }
 0x109   :  { %v53_v10 = vadd.f32 %v51_v9, %v43_v2 }
 0x10b   :  { %v54_v12 = vsub.f32 %v53_v10, %v39_v0 }
 0x10d   :  { %v55_v13 = vmul.f32 %v54_v12, %v52_v11 }
 0x10f   :  { %v56_v14 = vsel %vm40_vm0, %v55_v13, 0.0 }
 0x110   :  { %57 = vadd.xlane.f32.xlu1 %v56_v14 }
 0x183   :  { %v58_v15 = vpop.xlane.xlu1 %57 }
 0x184   :  { %60 = vst.msk [vmem:[%s156_s2] sm:$0xff] %vm59_vm1, %v58_v15 }
 0x185   :  { %65 = vsyncpa [#allocation3], 1 }
 0x186   :  { %66 = vsyncpa [#allocation5], 1 }

</bundles_post_ra>
